<compile_context>
chip_gen: v5e
topology: v5e:2x2
jax: 0.10.0
libtpu: 0.0.40
codegen_flags: <defaults>
</compile_context>

<pallas_src>
import functools

import jax
import jax.numpy as jnp
import numpy as np
from jax import lax
from jax.experimental import pallas as pl
from jax.experimental.pallas import tpu as pltpu


# ----------------------------------------------------------------------------------
# helpers
# ----------------------------------------------------------------------------------

_PRED_PAD = 1.0e6    # sentinel coordinate for padded predicted points
_GT_PAD = -1.0e6     # sentinel coordinate for padded ground-truth points


def _round_up(x, m):
    return -(-x // m) * m


# ----------------------------------------------------------------------------------
# chamfer (+ optional normal) kernel: online, Q-streamed, P-tiled
# ----------------------------------------------------------------------------------

def _chamfer_kernel(*refs, compute_normals, p_total, q_total,
                    p_valid, q_valid, p_needs_mask, q_needs_mask):
    """Grid (N, P_pad//TP, Q_pad//TQ); Q innermost.

    refs (compute_normals=True):
      xp_ref (TP,3), xgt_ref (3,TQ), nxp_ref (TP,3), nygt_ref (3,TQ),
      out_ref (1,4) SMEM, rmin_x (TP,1), rcos_x (TP,1),
      rmin_y (nQ,TQ), rcos_y (nQ,TQ), acc_ref SMEM (2,)
    refs (compute_normals=False):
      xp_ref, xgt_ref, out_ref, rmin_x, rmin_y, acc_ref
    """
    if compute_normals:
        (xp_ref, xgt_ref, nxp_ref, nygt_ref, out_ref,
         rmin_x, rcos_x, rmin_y, rcos_y, acc_ref) = refs
    else:
        (xp_ref, xgt_ref, out_ref, rmin_x, rmin_y, acc_ref) = refs
        rcos_x = rcos_y = None

    pi = pl.program_id(1)
    qi = pl.program_id(2)
    n_pt = pl.num_programs(1)
    n_qt = pl.num_programs(2)
    tp = xp_ref.shape[0]
    tq = xgt_ref.shape[1]

    # ---- per-batch init ----
    @pl.when(jnp.logical_and(pi == 0, qi == 0))
    def _():
        rmin_y[...] = jnp.full_like(rmin_y, jnp.inf)
        acc_ref[0] = jnp.float32(0.0)
        acc_ref[1] = jnp.float32(0.0)
        if compute_normals:
            rcos_y[...] = jnp.zeros_like(rcos_y)

    # ---- per-p-tile init (start of each q sweep) ----
    @pl.when(qi == 0)
    def _():
        rmin_x[...] = jnp.full_like(rmin_x, jnp.inf)
        if compute_normals:
            rcos_x[...] = jnp.zeros_like(rcos_x)

    xp = xp_ref[...]                                    # (TP, 3)
    xg_t = xgt_ref[...]                                 # (3, TQ) -- lane-dense, no transpose

    # Pairwise squared distances: |x|^2 - 2 x.y + |y|^2  -> (TP, TQ)
    xx = jnp.sum(xp * xp, axis=1, keepdims=True)        # (TP, 1)
    yy = jnp.sum(xg_t * xg_t, axis=0, keepdims=True)    # (1, TQ) -- lane-aligned, no yy.T
    xy = lax.dot_general(xp, xg_t, (((1,), (0,)), ((), ())),
                         preferred_element_type=jnp.float32)   # MXU, K=3 (idle slot)
    dist = (xx - 2.0 * xy) + yy

    if compute_normals:
        # normals are pre-normalized in the wrapper -> plain MXU dot gives cosine.
        cos = lax.dot_general(nxp_ref[...], nygt_ref[...], (((1,), (0,)), ((), ())),
                              preferred_element_type=jnp.float32)   # (TP, TQ)

    # ---- pred -> gt: per-row online running min (+ cos payload) ----
    row_min = jnp.min(dist, axis=1, keepdims=True)      # (TP, 1)
    old_rx = rmin_x[...]
    better_x = row_min < old_rx
    rmin_x[...] = jnp.where(better_x, row_min, old_rx)
    if compute_normals:
        row_cos = jnp.max(jnp.where(dist == row_min, cos, -jnp.inf),
                          axis=1, keepdims=True)         # (TP, 1)
        rcos_x[...] = jnp.where(better_x, row_cos, rcos_x[...])

    # ---- gt -> pred: per-column running min carried across p tiles ----
    col_min = jnp.min(dist, axis=0, keepdims=True)       # (1, TQ)
    old_ry = rmin_y[pl.ds(qi, 1), :]
    better_y = col_min < old_ry
    rmin_y[pl.ds(qi, 1), :] = jnp.where(better_y, col_min, old_ry)
    if compute_normals:
        col_cos = jnp.max(jnp.where(dist == col_min, cos, -jnp.inf),
                          axis=0, keepdims=True)          # (1, TQ)
        rcos_y[pl.ds(qi, 1), :] = jnp.where(better_y, col_cos,
                                            rcos_y[pl.ds(qi, 1), :])

    # ---- p-tile finalize: fold this p tile's pred->gt results into the SMEM acc ----
    @pl.when(qi == n_qt - 1)
    def _():
        rm = rmin_x[...]                                  # (TP, 1)
        if p_needs_mask:
            grow = pi * tp + lax.broadcasted_iota(jnp.int32, (tp, 1), 0)
            valid_p = grow < p_valid
            rm = jnp.where(valid_p, rm, 0.0)
        acc_ref[0] = acc_ref[0] + jnp.sum(rm)
        if compute_normals:
            cx = 1.0 - jnp.abs(rcos_x[...])
            if p_needs_mask:
                cx = jnp.where(valid_p, cx, 0.0)
            acc_ref[1] = acc_ref[1] + jnp.sum(cx)

    # ---- batch finalize ----
    @pl.when(jnp.logical_and(pi == n_pt - 1, qi == n_qt - 1))
    def _():
        ry = rmin_y[...]                                  # (nQ, TQ)
        if q_needs_mask:
            gcol = (lax.broadcasted_iota(jnp.int32, ry.shape, 0) * tq
                    + lax.broadcasted_iota(jnp.int32, ry.shape, 1))
            valid_q = gcol < q_valid
            ry = jnp.where(valid_q, ry, 0.0)
        out_ref[0, 0] = acc_ref[0] / p_total              # mean cham_x
        out_ref[0, 1] = jnp.sum(ry) / q_total             # mean cham_y
        if compute_normals:
            cy = 1.0 - jnp.abs(rcos_y[...])
            if q_needs_mask:
                cy = jnp.where(valid_q, cy, 0.0)
            out_ref[0, 2] = acc_ref[1] / p_total          # mean norm_x
            out_ref[0, 3] = jnp.sum(cy) / q_total         # mean norm_y
        else:
            out_ref[0, 2] = jnp.float32(0.0)
            out_ref[0, 3] = jnp.float32(0.0)


def chamfer_distance(points_pred, points_gt, normals_pred=None, normals_gt=None,
                     *, compute_normals=True, p_tile=1024, q_tile=1024):
    """pytorch3d chamfer_distance semantics (point mean, batch mean).

    Returns (chamfer_loss, normal_loss); normal_loss is 0.0 if compute_normals=False.
    Tiles default to 1024x1024 on every TPU generation (VMEM use is well under 64 MiB).
    # TODO(synk): on v7x with N==1 a second "parallel" axis splitting the P tiles
    # across the two TensorCores would recover the idle core.
    """
    N, P, _ = points_pred.shape
    Q = points_gt.shape[1]
    compute_normals = (compute_normals and normals_pred is not None
                       and normals_gt is not None)

    # --- tile choice + wrapper-side padding (lane-dense multiples of 8 / 128) ---
    p_tile = max(8, (int(p_tile) // 8) * 8)
    q_tile = max(128, (int(q_tile) // 128) * 128)
    tp = p_tile if P > p_tile else _round_up(P, 8)
    tq = q_tile if Q > q_tile else _round_up(Q, 128)
    p_pad = _round_up(P, tp)
    q_pad = _round_up(Q, tq)
    n_pt = p_pad // tp
    n_qt = q_pad // tq

    xp = points_pred.astype(jnp.float32)
    xg = points_gt.astype(jnp.float32)
    if p_pad != P:
        xp = jnp.pad(xp, ((0, 0), (0, p_pad - P), (0, 0)), constant_values=_PRED_PAD)
    if q_pad != Q:
        xg = jnp.pad(xg, ((0, 0), (0, q_pad - Q), (0, 0)), constant_values=_GT_PAD)
    xg_t = jnp.swapaxes(xg, 1, 2)                    # (N, 3, Q_pad): MXU RHS is (K, N)

    inputs = [xp, xg_t]
    in_specs = [pl.BlockSpec((None, tp, 3), lambda n, i, j: (n, i, 0)),
                pl.BlockSpec((None, 3, tq), lambda n, i, j: (n, 0, j))]
    scratch = [pltpu.VMEM((tp, 1), jnp.float32)]     # running row min (pred -> gt)

    if compute_normals:
        eps = 1e-6
        nx = normals_pred.astype(jnp.float32)
        ny = normals_gt.astype(jnp.float32)
        # Normalize ONCE here (XLA); padded rows stay zero -> cos contribution 0,
        # and padded rows/cols are masked out at finalize anyway.
        nx = nx / jnp.maximum(jnp.linalg.norm(nx, axis=-1, keepdims=True), eps)
        ny = ny / jnp.maximum(jnp.linalg.norm(ny, axis=-1, keepdims=True), eps)
        if p_pad != P:
            nx = jnp.pad(nx, ((0, 0), (0, p_pad - P), (0, 0)))
        if q_pad != Q:
            ny = jnp.pad(ny, ((0, 0), (0, q_pad - Q), (0, 0)))
        ny_t = jnp.swapaxes(ny, 1, 2)
        inputs += [nx, ny_t]
        in_specs += [pl.BlockSpec((None, tp, 3), lambda n, i, j: (n, i, 0)),
                     pl.BlockSpec((None, 3, tq), lambda n, i, j: (n, 0, j))]
        scratch.append(pltpu.VMEM((tp, 1), jnp.float32))      # cos payload (pred -> gt)

    scratch.append(pltpu.VMEM((n_qt, tq), jnp.float32))       # running col min (gt -> pred)
    if compute_normals:
        scratch.append(pltpu.VMEM((n_qt, tq), jnp.float32))   # cos payload (gt -> pred)
    scratch.append(pltpu.SMEM((2,), jnp.float32))             # cham_x / norm_x sums

    kernel = functools.partial(
        _chamfer_kernel, compute_normals=compute_normals,
        p_total=float(P), q_total=float(Q),
        p_valid=P, q_valid=Q,
        p_needs_mask=(p_pad != P), q_needs_mask=(q_pad != Q))

    parts = pl.pallas_call(
        kernel,
        out_shape=jax.ShapeDtypeStruct((N, 4), jnp.float32),
        grid=(N, n_pt, n_qt),
        in_specs=in_specs,
        out_specs=pl.BlockSpec((1, 4), lambda n, i, j: (n, 0),
                               memory_space=pltpu.MemorySpace.SMEM),
        scratch_shapes=scratch,
        compiler_params=pltpu.CompilerParams(
            dimension_semantics=("parallel", "arbitrary", "arbitrary"),
            vmem_limit_bytes=48 * 1024 * 1024,
        ),
    )(*inputs)

    cham = jnp.mean(parts[:, 0]) + jnp.mean(parts[:, 1])
    if compute_normals:
        normal = jnp.mean(parts[:, 2]) + jnp.mean(parts[:, 3])
    else:
        normal = jnp.float32(0.0)
    return cham, normal


# ----------------------------------------------------------------------------------
# edge-length kernel: all meshes in a single grid step, lane-dense (N*3, E) slab
# ----------------------------------------------------------------------------------

def _edge_kernel(v0_ref, v1_ref, out_ref, *, denom):
    d = v0_ref[...].astype(jnp.float32) - v1_ref[...].astype(jnp.float32)   # (N*3, E)
    out_ref[0, 0] = jnp.sum(d * d) / denom


def mesh_edge_loss(edge_v0, edge_v1):
    """pytorch3d mesh_edge_loss for equal-size meshes: mean_n(mean_e ||v0 - v1||^2)."""
    N, E, _ = edge_v0.shape
    # Layout plumbing (free in XLA): coordinates on sublanes, edges on lanes; one slab.
    # TODO(synk): tile over E if edge counts ever exceed a few hundred thousand.
    v0 = jnp.swapaxes(edge_v0, 1, 2).reshape(N * 3, E)
    v1 = jnp.swapaxes(edge_v1, 1, 2).reshape(N * 3, E)
    out = pl.pallas_call(
        functools.partial(_edge_kernel, denom=float(N * E)),
        out_shape=jax.ShapeDtypeStruct((1, 1), jnp.float32),
        grid=(1,),
        in_specs=[pl.BlockSpec((N * 3, E), lambda i: (0, 0)),
                  pl.BlockSpec((N * 3, E), lambda i: (0, 0))],
        out_specs=pl.BlockSpec((1, 1), lambda i: (0, 0),
                               memory_space=pltpu.MemorySpace.SMEM),
    )(v0, v1)
    return out[0, 0]


# ----------------------------------------------------------------------------------
# BCE-with-logits kernel (grid-tiled, lane-dense, SMEM accumulator)
# ----------------------------------------------------------------------------------

def _bce_kernel(x_ref, y_ref, out_ref, acc_ref, *, total_count, needs_mask):
    i = pl.program_id(0)
    n = pl.num_programs(0)

    @pl.when(i == 0)
    def _():
        acc_ref[0] = jnp.float32(0.0)

    x = x_ref[...].astype(jnp.float32)
    y = y_ref[...].astype(jnp.float32)
    loss = jnp.maximum(x, 0.0) - x * y + jnp.log(1.0 + jnp.exp(-jnp.abs(x)))

    if needs_mask:
        # Padding can only live in the LAST tile -> gate the mask behind pl.when.
        @pl.when(i < n - 1)
        def _():
            acc_ref[0] = acc_ref[0] + jnp.sum(loss)

        @pl.when(i == n - 1)
        def _():
            rows, cols = loss.shape
            flat = (i * rows * cols
                    + lax.broadcasted_iota(jnp.int32, loss.shape, 0) * cols
                    + lax.broadcasted_iota(jnp.int32, loss.shape, 1))
            acc_ref[0] = acc_ref[0] + jnp.sum(jnp.where(flat < total_count, loss, 0.0))
    else:
        acc_ref[0] = acc_ref[0] + jnp.sum(loss)

    @pl.when(i == n - 1)
    def _():
        out_ref[0, 0] = acc_ref[0] / total_count


def bce_with_logits_mean(voxel_scores, voxels_gt, *, tile_rows=512):
    """binary_cross_entropy_with_logits, mean reduction, streamed over row tiles."""
    total = int(voxel_scores.size)
    lanes = 128
    rows = -(-total // lanes)
    tr = max(8, (int(tile_rows) // 8) * 8)
    tile_r = tr if rows > tr else _round_up(max(rows, 1), 8)
    r_pad = _round_up(rows, tile_r)
    padded = r_pad * lanes

    x = jnp.ravel(voxel_scores).astype(jnp.float32)
    y = jnp.ravel(voxels_gt).astype(jnp.float32)
    if padded != total:
        x = jnp.pad(x, (0, padded - total))
        y = jnp.pad(y, (0, padded - total))
    xs = x.reshape(r_pad, lanes)
    ys = y.reshape(r_pad, lanes)

    kernel = functools.partial(_bce_kernel, total_count=total,
                               needs_mask=(padded != total))
    out = pl.pallas_call(
        kernel,
        out_shape=jax.ShapeDtypeStruct((1, 1), jnp.float32),
        grid=(r_pad // tile_r,),
        in_specs=[
            pl.BlockSpec((tile_r, lanes), lambda i: (i, 0)),
            pl.BlockSpec((tile_r, lanes), lambda i: (i, 0)),
        ],
        out_specs=pl.BlockSpec((1, 1), lambda i: (0, 0),
                               memory_space=pltpu.MemorySpace.SMEM),
        scratch_shapes=[pltpu.SMEM((1,), jnp.float32)],
        compiler_params=pltpu.CompilerParams(dimension_semantics=("arbitrary",)),
    )(xs, ys)
    return out[0, 0]


# ----------------------------------------------------------------------------------
# MeshLoss module (forward semantics)
# ----------------------------------------------------------------------------------

class MeshLoss:
    def __init__(self, chamfer_weight=1.0, normal_weight=0.0, edge_weight=0.1,
                 voxel_weight=0.0, gt_num_samples=5000, pred_num_samples=5000,
                 chamfer_p_tile=1024, chamfer_q_tile=1024, bce_tile_rows=512):
        self.chamfer_weight = chamfer_weight
        self.normal_weight = normal_weight
        self.edge_weight = edge_weight
        self.gt_num_samples = gt_num_samples
        self.pred_num_samples = pred_num_samples
        self.voxel_weight = voxel_weight
        self.chamfer_p_tile = chamfer_p_tile
        self.chamfer_q_tile = chamfer_q_tile
        self.bce_tile_rows = bce_tile_rows
        self.skip_mesh_loss = (chamfer_weight == 0.0 and normal_weight == 0.0
                               and edge_weight == 0.0)
        # When normal_weight == 0 (the module default) the cosine path is skipped
        # entirely inside the chamfer kernel and the reported normal loss is 0.0.
        self.compute_normals = (normal_weight != 0.0)

    def __call__(self, voxel_scores, meshes_pred, voxels_gt, meshes_gt):
        # meshes_gt given as the tuple (points_gt, normals_gt) path of the reference.
        points_gt, normals_gt = meshes_gt
        total_loss = jnp.float32(0.0)
        losses = {}
        if voxel_scores is not None and voxels_gt is not None and self.voxel_weight > 0:
            voxel_loss = bce_with_logits_mean(voxel_scores,
                                              voxels_gt.astype(jnp.float32),
                                              tile_rows=self.bce_tile_rows)
            total_loss = total_loss + self.voxel_weight * voxel_loss
            losses["voxel"] = voxel_loss

        if isinstance(meshes_pred, dict):
            meshes_pred = [meshes_pred]
        elif meshes_pred is None:
            meshes_pred = []

        if not self.skip_mesh_loss:
            for i, cur_meshes_pred in enumerate(meshes_pred):
                cur_loss, cur_losses = self._mesh_loss(cur_meshes_pred,
                                                       points_gt, normals_gt)
                total_loss = total_loss + cur_loss / len(meshes_pred)
                for k, v in cur_losses.items():
                    losses["%s_%d" % (k, i)] = v
        return total_loss, losses

    def _mesh_loss(self, mesh_pred, points_gt, normals_gt):
        # TODO(synk): sample_points_from_meshes (stochastic, area-weighted face
        # sampling) has no clean Pallas equivalent; the "mesh" here carries
        # pre-sampled surface points/normals and gathered edge endpoints.
        points_pred = mesh_pred["sampled_points"]
        normals_pred = mesh_pred["sampled_normals"]

        cham_loss, normal_loss = chamfer_distance(
            points_pred, points_gt, normals_pred, normals_gt,
            compute_normals=self.compute_normals,
            p_tile=self.chamfer_p_tile, q_tile=self.chamfer_q_tile)
        edge_loss = mesh_edge_loss(mesh_pred["edge_v0"], mesh_pred["edge_v1"])

        total = (self.chamfer_weight * cham_loss
                 + self.normal_weight * normal_loss
                 + self.edge_weight * edge_loss)
        losses = {"chamfer": cham_loss, "normal": normal_loss, "edge": edge_loss}
        return total, losses


# ----------------------------------------------------------------------------------
# Demo / smoke test (small shapes; non-aligned P/Q + small tiles so the padding,
# masking and multi-tile streaming paths are all exercised)
# ----------------------------------------------------------------------------------

if __name__ == "__main__":
    key = jax.random.PRNGKey(0)
    ks = jax.random.split(key, 10)

    N, P, Q = 2, 120, 200          # deliberately NOT multiples of the tiles / 128
    V, E = 64, 100                 # verts / edges of the predicted mesh
    D = 24                         # voxel grid side

    def unit(v):
        return v / jnp.maximum(jnp.linalg.norm(v, axis=-1, keepdims=True), 1e-6)

    points_gt = 1.7 * jax.random.normal(ks[0], (N, Q, 3), jnp.float32)
    points_pred = 1.7 * jax.random.normal(ks[1], (N, P, 3), jnp.float32)
    # Normals follow point directions (NN-normal term is informative); random
    # magnitudes exercise the wrapper-side normalization.
    normals_gt = unit(points_gt) * (0.5 + 1.5 * jax.random.uniform(ks[2], (N, Q, 1)))
    normals_pred = unit(points_pred) * (0.5 + 1.5 * jax.random.uniform(ks[3], (N, P, 1)))

    verts = jax.random.normal(ks[4], (N, V, 3), jnp.float32)
    edges = jax.random.randint(ks[5], (N, E, 2), 0, V)
    edge_v0 = jnp.take_along_axis(verts, jnp.broadcast_to(edges[..., 0:1], (N, E, 3)), axis=1)
    edge_v1 = jnp.take_along_axis(verts, jnp.broadcast_to(edges[..., 1:2], (N, E, 3)), axis=1)

    voxel_scores = jax.random.normal(ks[6], (N, D, D, D), jnp.float32)
    voxels_gt = (jax.random.normal(ks[7], (N, D, D, D), jnp.float32) > 0.0)

    meshes_pred = {
        "sampled_points": points_pred,
        "sampled_normals": normals_pred,
        "edge_v0": edge_v0,
        "edge_v1": edge_v1,
    }

    # ---- run 1: normals enabled (full cosine path) ----
    criterion = MeshLoss(chamfer_weight=1.0, normal_weight=0.5, edge_weight=0.1,
                         voxel_weight=0.5, gt_num_samples=Q, pred_num_samples=P,
                         # small tiles so the streamed / multi-tile / padded paths run
                         chamfer_p_tile=64, chamfer_q_tile=128, bce_tile_rows=64)
    total_loss, losses = criterion(voxel_scores, meshes_pred, voxels_gt,
                                   (points_gt, normals_gt))
    total_loss = jax.block_until_ready(total_loss)
    losses = {k: jax.block_until_ready(v) for k, v in losses.items()}

    # ---- run 2: normal_weight == 0 -> cosine path compiled out ----
    criterion_nc = MeshLoss(chamfer_weight=1.0, normal_weight=0.0, edge_weight=0.1,
                            voxel_weight=0.0, gt_num_samples=Q, pred_num_samples=P,
                            chamfer_p_tile=64, chamfer_q_tile=128)
    total_nc, losses_nc = criterion_nc(voxel_scores, meshes_pred, voxels_gt,
                                       (points_gt, normals_gt))
    total_nc = jax.block_until_ready(total_nc)
    losses_nc = {k: jax.block_until_ready(v) for k, v in losses_nc.items()}

    # ---- pure-JAX reference (loose tolerances: the in-kernel K=3 MXU dot + expanded
    # squared-distance formula can differ slightly from the exact f32 reference) ----
    diff = points_pred[:, :, None, :] - points_gt[:, None, :, :]
    dist_ref = jnp.sum(diff * diff, axis=-1)                                # (N,P,Q)
    cham_ref = jnp.mean(jnp.min(dist_ref, axis=2)) + jnp.mean(jnp.min(dist_ref, axis=1))
    eps = 1e-6
    nxn = normals_pred / jnp.maximum(jnp.linalg.norm(normals_pred, axis=-1, keepdims=True), eps)
    nyn = normals_gt / jnp.maximum(jnp.linalg.norm(normals_gt, axis=-1, keepdims=True), eps)
    cos_ref = jnp.sum(nxn[:, :, None, :] * nyn[:, None, :, :], axis=-1)     # (N,P,Q)
    ix = jnp.argmin(dist_ref, axis=2)
    iy = jnp.argmin(dist_ref, axis=1)
    cos_x = jnp.take_along_axis(cos_ref, ix[:, :, None], axis=2)[..., 0]
    cos_y = jnp.take_along_axis(cos_ref, iy[:, None, :], axis=1)[:, 0, :]
    norm_ref = jnp.mean(1.0 - jnp.abs(cos_x)) + jnp.mean(1.0 - jnp.abs(cos_y))
    edge_ref = jnp.mean(jnp.sum((edge_v0 - edge_v1) ** 2, axis=-1))
    xs = voxel_scores.astype(jnp.float32)
    yv = voxels_gt.astype(jnp.float32)
    bce_ref = jnp.mean(jnp.maximum(xs, 0.0) - xs * yv + jnp.log1p(jnp.exp(-jnp.abs(xs))))
    total_ref = 0.5 * bce_ref + 1.0 * cham_ref + 0.5 * norm_ref + 0.1 * edge_ref
    total_ref_nc = 1.0 * cham_ref + 0.1 * edge_ref

    np.testing.assert_allclose(float(losses["voxel"]), float(bce_ref), rtol=2e-3, atol=1e-5)
    np.testing.assert_allclose(float(losses["edge_0"]), float(edge_ref), rtol=1e-3, atol=1e-5)
    np.testing.assert_allclose(float(losses["chamfer_0"]), float(cham_ref), rtol=0.1, atol=0.1)
    np.testing.assert_allclose(float(losses["normal_0"]), float(norm_ref), rtol=0.1, atol=0.2)
    np.testing.assert_allclose(float(total_loss), float(total_ref), rtol=0.1, atol=0.3)

    np.testing.assert_allclose(float(losses_nc["chamfer_0"]), float(cham_ref), rtol=0.1, atol=0.1)
    assert float(losses_nc["normal_0"]) == 0.0
    np.testing.assert_allclose(float(total_nc), float(total_ref_nc), rtol=0.1, atol=0.2)

    print("KERNEL_OK")
</pallas_src>

<mosaic_0001>
module attributes {stable_mosaic.version = 11 : i64} {
  func.func @_bce_kernel(%arg0: i32, %arg1: memref<64x128xf32, #tpu.memory_space<vmem>>, %arg2: memref<64x128xf32, #tpu.memory_space<vmem>>, %arg3: memref<1x1xf32, #tpu.memory_space<smem>>, %arg4: memref<1xf32, #tpu.memory_space<smem>>) attributes {dimension_semantics = [#tpu.dimension_semantics<arbitrary>], iteration_bounds = array<i64: 4>, scalar_prefetch = 0 : i64, scratch_operands = 1 : i64, tpu.core_type = #tpu.core_type<tc>, window_params = [{transform_indices = @transform_0, window_bounds = array<i64: 64, 128>}, {transform_indices = @transform_1, window_bounds = array<i64: 64, 128>}, {transform_indices = @transform_2, window_bounds = array<i64: 1, 1>}]} {
    %c0_i32 = arith.constant 0 : i32
    %0 = arith.cmpi eq, %arg0, %c0_i32 : i32
    %1 = arith.extui %0 : i1 to i32
    %c0_i32_0 = arith.constant 0 : i32
    %2 = arith.cmpi ne, %1, %c0_i32_0 : i32
    scf.if %2 {
      %cst_11 = arith.constant 0.000000e+00 : f32
      %c0_12 = arith.constant 0 : index
      %26 = memref.load %arg4[%c0_12] : memref<1xf32, #tpu.memory_space<smem>>
      memref.store %cst_11, %arg4[%c0_12] : memref<1xf32, #tpu.memory_space<smem>>
    } else {
    }
    %c0 = arith.constant 0 : index
    %c0_1 = arith.constant 0 : index
    %3 = vector.load %arg1[%c0, %c0_1] : memref<64x128xf32, #tpu.memory_space<vmem>>, vector<64x128xf32>
    %c0_2 = arith.constant 0 : index
    %c0_3 = arith.constant 0 : index
    %4 = vector.load %arg2[%c0_2, %c0_3] : memref<64x128xf32, #tpu.memory_space<vmem>>, vector<64x128xf32>
    %cst = arith.constant 0.000000e+00 : f32
    %5 = vector.broadcast %cst : f32 to vector<64x128xf32>
    %6 = arith.maximumf %3, %5 : vector<64x128xf32>
    %7 = arith.mulf %3, %4 : vector<64x128xf32>
    %8 = arith.subf %6, %7 : vector<64x128xf32>
    %9 = math.absf %3 : vector<64x128xf32>
    %cst_4 = arith.constant 0.000000e+00 : f32
    %10 = vector.broadcast %cst_4 : f32 to vector<64x128xf32>
    %11 = arith.subf %10, %9 : vector<64x128xf32>
    %12 = math.exp %11 : vector<64x128xf32>
    %cst_5 = arith.constant 1.000000e+00 : f32
    %13 = vector.broadcast %cst_5 : f32 to vector<64x128xf32>
    %14 = arith.addf %13, %12 : vector<64x128xf32>
    %15 = math.log %14 : vector<64x128xf32>
    %16 = arith.addf %8, %15 : vector<64x128xf32>
    %c3_i32 = arith.constant 3 : i32
    %17 = arith.cmpi slt, %arg0, %c3_i32 : i32
    %18 = arith.extui %17 : i1 to i32
    %c0_i32_6 = arith.constant 0 : i32
    %19 = arith.cmpi ne, %18, %c0_i32_6 : i32
    scf.if %19 {
      %c0_11 = arith.constant 0 : index
      %26 = memref.load %arg4[%c0_11] : memref<1xf32, #tpu.memory_space<smem>>
      %27 = vector.shape_cast %16 : vector<64x128xf32> to vector<1x64x128xf32>
      %cst_12 = arith.constant dense<0.000000e+00> : vector<1xf32>
      %28 = vector.multi_reduction <add>, %27, %cst_12 [1, 2] : vector<1x64x128xf32> to vector<1xf32>
      %29 = vector.shape_cast %28 : vector<1xf32> to vector<1x1x1xf32>
      %30 = vector.extract %29[0, 0, 0] : f32 from vector<1x1x1xf32>
      %31 = arith.addf %26, %30 : f32
      %c0_13 = arith.constant 0 : index
      %32 = memref.load %arg4[%c0_13] : memref<1xf32, #tpu.memory_space<smem>>
      memref.store %31, %arg4[%c0_13] : memref<1xf32, #tpu.memory_space<smem>>
    } else {
    }
    %c3_i32_7 = arith.constant 3 : i32
    %20 = arith.cmpi eq, %arg0, %c3_i32_7 : i32
    %21 = arith.extui %20 : i1 to i32
    %c0_i32_8 = arith.constant 0 : i32
    %22 = arith.cmpi ne, %21, %c0_i32_8 : i32
    scf.if %22 {
      %c64_i32 = arith.constant 64 : i32
      %26 = arith.muli %arg0, %c64_i32 : i32
      %c128_i32 = arith.constant 128 : i32
      %27 = arith.muli %26, %c128_i32 : i32
      %28 = tpu.iota {dimensions = array<i32: 0>} : vector<64x128xi32>
      %c128_i32_11 = arith.constant 128 : i32
      %29 = vector.broadcast %c128_i32_11 : i32 to vector<64x128xi32>
      %30 = arith.muli %28, %29 : vector<64x128xi32>
      %31 = vector.broadcast %27 : i32 to vector<64x128xi32>
      %32 = arith.addi %31, %30 : vector<64x128xi32>
      %33 = tpu.iota {dimensions = array<i32: 1>} : vector<64x128xi32>
      %34 = arith.addi %32, %33 : vector<64x128xi32>
      %c0_12 = arith.constant 0 : index
      %35 = memref.load %arg4[%c0_12] : memref<1xf32, #tpu.memory_space<smem>>
      %c27648_i32 = arith.constant 27648 : i32
      %36 = vector.broadcast %c27648_i32 : i32 to vector<64x128xi32>
      %37 = arith.cmpi slt, %34, %36 : vector<64x128xi32>
      %cst_13 = arith.constant 0.000000e+00 : f32
      %38 = vector.broadcast %cst_13 : f32 to vector<64x128xf32>
      %39 = arith.select %37, %16, %38 : vector<64x128xi1>, vector<64x128xf32>
      %40 = vector.shape_cast %39 : vector<64x128xf32> to vector<1x64x128xf32>
      %cst_14 = arith.constant dense<0.000000e+00> : vector<1xf32>
      %41 = vector.multi_reduction <add>, %40, %cst_14 [1, 2] : vector<1x64x128xf32> to vector<1xf32>
      %42 = vector.shape_cast %41 : vector<1xf32> to vector<1x1x1xf32>
      %43 = vector.extract %42[0, 0, 0] : f32 from vector<1x1x1xf32>
      %44 = arith.addf %35, %43 : f32
      %c0_15 = arith.constant 0 : index
      %45 = memref.load %arg4[%c0_15] : memref<1xf32, #tpu.memory_space<smem>>
      memref.store %44, %arg4[%c0_15] : memref<1xf32, #tpu.memory_space<smem>>
    } else {
    }
    %c3_i32_9 = arith.constant 3 : i32
    %23 = arith.cmpi eq, %arg0, %c3_i32_9 : i32
    %24 = arith.extui %23 : i1 to i32
    %c0_i32_10 = arith.constant 0 : i32
    %25 = arith.cmpi ne, %24, %c0_i32_10 : i32
    scf.if %25 {
      %c0_11 = arith.constant 0 : index
      %26 = memref.load %arg4[%c0_11] : memref<1xf32, #tpu.memory_space<smem>>
      %cst_12 = arith.constant 2.764800e+04 : f32
      %27 = arith.divf %26, %cst_12 : f32
      %c0_13 = arith.constant 0 : index
      %c0_14 = arith.constant 0 : index
      %28 = memref.load %arg3[%c0_13, %c0_14] : memref<1x1xf32, #tpu.memory_space<smem>>
      memref.store %27, %arg3[%c0_13, %c0_14] : memref<1x1xf32, #tpu.memory_space<smem>>
    } else {
    }
    return
  }
  func.func @transform_0(%arg0: i32) -> (i32, i32) {
    %c0_i32 = arith.constant 0 : i32
    %c0_i32_0 = arith.constant 0 : i32
    return %arg0, %c0_i32 : i32, i32
  }
  func.func @transform_1(%arg0: i32) -> (i32, i32) {
    %c0_i32 = arith.constant 0 : i32
    %c0_i32_0 = arith.constant 0 : i32
    return %arg0, %c0_i32 : i32, i32
  }
  func.func @transform_2(%arg0: i32) -> (i32, i32) {
    %c0_i32 = arith.constant 0 : i32
    %c0_i32_0 = arith.constant 0 : i32
    %c0_i32_1 = arith.constant 0 : i32
    return %c0_i32, %c0_i32_0 : i32, i32
  }
}

</mosaic_0001>

<bundles_post_ra>
// kernel: tpu_custom_call.1
= control target key start
LH: loop header
LB: loop body
LE: loop exit
PB: predicated region body
PF: predicated region fallthrough
CT: control target
= control target key end

     0   :  { %7 = vsyncpa [#allocation4], 0  ;;  %s978_s0 = inlined_call_operand.hbm [shape: f32[256,128], index: 0, kind: input, shape index: {}]   ;;  %s979_s1 = inlined_call_operand.hbm [shape: f32[256,128], index: 1, kind: input, shape index: {}]   ;;  %s980_s2 = inlined_call_operand.hbm [shape: f32[1,1], index: 2, kind: output, shape index: {}]  }
   0x1   :  { %9 = vsyncpa [#allocation4 + $0x1], 0 }
   0x2   :  { %10 = vsyncpa [#allocation7], 0 }
   0x3   :  { %12 = vsyncpa [#allocation7 + $0x1], 0 }
   0x4   :  { %13 = vsyncpa [#allocation5], 0  ;;  %s758_s9 = smov 0   ;;  %s760_s10 = smov 0  }
   0x5   :  { %s762_s11 = smov 0   ;;  %s764_s12 = smov 0  }
   0x6 LB: > { %s777_s13 = sadd.s32 4294967295, %s736_s12   ;;  %s780_s14 = sadd.s32 1, %s736_s12   ;;  %s736_s12 = sphi %s764_s12, %s988_s12   ;;  %s732_s11 = sphi %s762_s11, %s987_s11   ;;  %s728_s10 = sphi %s760_s10, %s986_s10   ;;  %s724_s9 = sphi %s758_s9, %s985_s9  }
   0x7   : > { %s23_s15 = ssub.s32 %s736_s12, %s780_s14  ;;  %s26_s16 = sadd.s32 1, %s732_s11 }
   0x8   : > { %p24_p0 = scmp.eq.s32.totalorder %s23_s15, 0  ;;  %p33_p1 = scmp.ne.s32.totalorder %s732_s11, %s728_s10 }
   0x9   : > { %p34_p2 = scmp.eq.s32.totalorder %s736_s12, 0  ;;  %p39_p3 = scmp.ne.s32.totalorder %s728_s10, %s724_s9 }
   0xa   : > { %s790_s17 = scalar_select %p24_p0, %s732_s11, %s26_s16  }
   0xb   : > { %p792_p4 = por %p34_p2, %p33_p1  ;;  %p40_p5 = scmp.eq.s32.totalorder %s777_s13, 0 }
   0xc   : > { %p545_p6 = scmp.lt.s32.totalorder %s736_s12, 4  ;;  %s805_s20 = sand.u32 1, %s732_s11  }
   0xd   : > { %p800_p7 = por %p40_p5, %p39_p3  ;;  %s503_s21 = sshll.u32 %s805_s20, 6 }
   0xe   : > { %s520_s22 = sshll.u32 %s736_s12, 6  ;;  %s114_s26 = scalar_lea.vmem [#allocation3], %s503_s21 }
   0xf   : > { %s119_s25 = scalar_lea.hbm %s978_s0, %s520_s22  ;;  %s122_s27 = sshll.u32 %s114_s26, 4  ;;  %s123_s27 = int_to_ptr.vmem [resolvable:$true] %s122_s27 }
  0x10   : > { %s120_s28 = sshll.u32 %s119_s25, 4  ;;  %p818_p8 = pnand %p545_p6, %p792_p4  ;;  %s121_s28 = int_to_ptr.hbm [resolvable:$true] %s120_s28 }
  0x11   : > { %p509_p9 = scmp.ge.s32.totalorder %s736_s12, 1  ;;  %s111_s30 = scalar_lea.sflag [#allocation4], %s805_s20 }
  0x12   : > { %s620_s3 = sshra.s32 %s121_s28, 4  ;;  %p624_p11 = pneg %p818_p8  ;;  %s621_s3 = int_to_ptr.hbm [resolvable:$true] %s620_s3 }
  0x13   : > { %s622_s4 = scalar_lea.hbm %s621_s3, 64  ;;  %s627_s7 = scalar_lea.hbm %s978_s0, 256 }
  0x14   : > { %p623_p10 = scmp.ne.s32.totalorder %s621_s3, %s622_s4  ;;  %p628_p0 = scmp.lt.s32.totalorder %s621_s3, %s978_s0 }
  0x15   : > { %p629_p1 = scmp.lt.s32.totalorder %s627_s7, %s622_s4 }
  0x16   : > { %p625_p12 = pnand %p624_p11, %p623_p10 }
  0x17   : > { %p630_p2 = por %p629_p1, %p628_p0 }
  0x18   : > { %p626_p13 = pneg %p625_p12 }
  0x1a   : > { %p631_p3 = pnand %p630_p2, %p626_p13 }
  0x1c   : > { %634 = shalt.err (!%p631_p3)
}
  0x1d   : > { %s738_s15 = smov 128   ;;  %s739_s16 = smov 8  }
  0x1e   : > { %541 = dma.hbm_to_vmem [thread:$0]  (!%p818_p8), %s121_s28, 1024, %s123_s27, %s111_s30, %s738_s15, %s738_s15, %s739_s16  }
  0x1f   : > { %p152_p4 = scmp.lt.s32.totalorder %s736_s12, 5  ;;  %s141_s24 = scalar_lea.hbm %s979_s1, %s520_s22 }
  0x20   : > { %s142_s26 = sshll.u32 %s141_s24, 4  ;;  %s136_s3 = scalar_lea.vmem [#allocation6], %s503_s21  ;;  %s143_s26 = int_to_ptr.hbm [resolvable:$true] %s142_s26 }
  0x21   : > { %p845_p6 = pnand %p509_p9, %p152_p4  ;;  %s144_s4 = sshll.u32 %s136_s3, 4  ;;  %s145_s4 = int_to_ptr.vmem [resolvable:$true] %s144_s4 }
  0x22   : > { %s133_s5 = scalar_lea.sflag [#allocation7], %s805_s20  ;;  %s650_s6 = sshra.s32 %s143_s26, 4  ;;  %s651_s6 = int_to_ptr.hbm [resolvable:$true] %s650_s6 }
  0x23   : > { %s652_s27 = scalar_lea.hbm %s651_s6, 64  ;;  %s657_s28 = scalar_lea.hbm %s979_s1, 256 }
  0x24   : > { %p653_p10 = scmp.ne.s32.totalorder %s651_s6, %s652_s27  ;;  %p658_p9 = scmp.lt.s32.totalorder %s651_s6, %s979_s1 }
  0x25   : > { %p659_p0 = scmp.lt.s32.totalorder %s657_s28, %s652_s27 }
  0x26   : > { %p655_p12 = pnand %p653_p10, %p624_p11 }
  0x27   : > { %p660_p1 = por %p659_p0, %p658_p9 }
  0x28   : > { %p656_p13 = pneg %p655_p12 }
  0x2a   : > { %p661_p2 = pnand %p660_p1, %p656_p13 }
  0x2c   : > { %664 = shalt.err (!%p661_p2)
}
  0x2d   : > { %544 = dma.hbm_to_vmem [thread:$0]  (!%p818_p8), %s143_s26, 1024, %s145_s4, %s133_s5, %s738_s15, %s738_s15, %s739_s16  }
  0x2e   : > { %156 = sbr.rel (%p845_p6) target bundleno = 508 (0x1fc), region = 28  ;;  %s158_s20 = sand.u32 (!%p845_p6), 1, %s728_s10  }
  0x2f   : > { %s510_s21 = sshll.u32 (!%p845_p6), %s158_s20, 6  ;;  %s159_s8 = scalar_lea.sflag (!%p845_p6), [#allocation4], %s158_s20 }
  0x30   : > { %s162_s9 = scalar_lea.vmem (!%p845_p6), [#allocation3], %s510_s21 }
  0x33   : > { %711 = dma.done.wait (%p800_p7), %s159_s8, 1024  }
  0x34   : > { %713 = vsyncadd (%p800_p7), %s159_s8, 4294966272  ;;  %s169_s18 = scalar_lea.sflag [#allocation7], %s158_s20  ;;  %s870_s23 = scalar_lea.vmem [#allocation6], %s510_s21 }
  0x35   : > { %715 = dma.done.wait (%p800_p7), %s169_s18, 1024  }
  0x36   : > { %717 = vsyncadd (%p800_p7), %s169_s18, 4294966272  ;;  %s740_s29 = smov 0.0   ;;  %v878_v0 = vld [vmem:[%s162_s9] sm:$0xff]  ;;  %v880_v1 = vld [vmem:[%s162_s9 + $0x8] sm:$0xff] }
  0x37   : > { %533 = sst [smem:[#allocation2]] (%p40_p5), %s740_s29  ;;  %v882_v2 = vld [vmem:[%s162_s9 + $0x10] sm:$0xff]  ;;  %v884_v3 = vld [vmem:[%s162_s9 + $0x18] sm:$0xff]  ;;  %v886_v4 = vld [vmem:[%s162_s9 + $0x20] sm:$0xff]  ;;  %v242_v8 = vand.u32 2147483647, %v878_v0 }
  0x38   : > { %v888_v5 = vld [vmem:[%s162_s9 + $0x28] sm:$0xff]  ;;  %v890_v6 = vld [vmem:[%s162_s9 + $0x30] sm:$0xff]  ;;  %v892_v7 = vld [vmem:[%s162_s9 + $0x38] sm:$0xff]  ;;  %v243_v9 = vand.u32 2147483647, %v880_v1  ;;  %v218_v41 = vmax.f32 %v878_v0, 0.0 }
  0x39   : > { %v244_v10 = vand.u32 2147483647, %v882_v2  ;;  %v245_v11 = vand.u32 2147483647, %v884_v3  ;;  %v246_v12 = vand.u32 2147483647, %v886_v4 }
  0x3a   : > { %v247_v13 = vand.u32 2147483647, %v888_v5  ;;  %v248_v14 = vand.u32 2147483647, %v890_v6  ;;  %v249_v15 = vand.u32 2147483647, %v892_v7 }
  0x3b   : > { %v250_v16 = vsub.f32 0.0, %v242_v8  ;;  %v251_v17 = vsub.f32 0.0, %v243_v9  ;;  %v252_v18 = vsub.f32 0.0, %v244_v10  ;;  %v253_v19 = vsub.f32 0.0, %v245_v11  ;;  %v210_v34 = vld [vmem:[%s870_s23] sm:$0xff]  ;;  %v211_v37 = vld [vmem:[%s870_s23 + $0x8] sm:$0xff] }
  0x3c   : > { %v254_v20 = vsub.f32 0.0, %v246_v12  ;;  %v255_v21 = vsub.f32 0.0, %v247_v13  ;;  %v256_v22 = vsub.f32 0.0, %v248_v14  ;;  %v257_v26 = vsub.f32 0.0, %v249_v15  ;;  %v212_v40 = vld [vmem:[%s870_s23 + $0x10] sm:$0xff]  ;;  %v213_v45 = vld [vmem:[%s870_s23 + $0x18] sm:$0xff] }
  0x3d   : > { %v258_v23 = vmul.f32 1.442695, %v250_v16  ;;  %v260_v24 = vmul.f32 1.442695, %v251_v17  ;;  %v262_v25 = vmul.f32 1.442695, %v252_v18  ;;  %v226_v47 = vmul.f32 %v210_v34, %v878_v0 }
  0x3e   : > { %v264_v27 = vmul.f32 1.442695, %v253_v19  ;;  %v266_v28 = vmul.f32 1.442695, %v254_v20  ;;  %v268_v29 = vmul.f32 1.442695, %v255_v21  ;;  %v227_v52 = vmul.f32 %v211_v37, %v880_v1 }
  0x3f   : > { %586 = vpow2.f32 %v258_v23  ;;  %v270_v30 = vmul.f32 1.442695, %v256_v22  ;;  %v272_v31 = vmul.f32 1.442695, %v257_v26  ;;  %v219_v42 = vmax.f32 %v880_v1, 0.0  ;;  %v214_v50 = vld [vmem:[%s870_s23 + $0x20] sm:$0xff] }
  0x40   : > { %588 = vpow2.f32 %v260_v24  ;;  %v220_v46 = vmax.f32 %v882_v2, 0.0  ;;  %v221_v51 = vmax.f32 %v884_v3, 0.0  ;;  %v215_v55 = vld [vmem:[%s870_s23 + $0x28] sm:$0xff]  ;;  %v222_v56 = vmax.f32 %v886_v4, 0.0  ;;  %v216_v60 = vld [vmem:[%s870_s23 + $0x30] sm:$0xff]  ;;  %v217_v0 = vld [vmem:[%s870_s23 + $0x38] sm:$0xff] }
  0x41   : > { %590 = vpow2.f32 %v262_v25  ;;  %v228_v57 = vmul.f32 %v212_v40, %v882_v2  ;;  %v223_v61 = vmax.f32 %v888_v5, 0.0  ;;  %v229_v62 = vmul.f32 %v213_v45, %v884_v3  ;;  %p513_p5 = scmp.ge.s32.totalorder %s777_s13, 3 }
  0x42   : > { %592 = vpow2.f32 %v264_v27  ;;  %v230_v1 = vmul.f32 %v214_v50, %v886_v4  ;;  %v234_v8 = vsub.f32 %v218_v41, %v226_v47  ;;  %v224_v11 = vmax.f32 %v890_v6, 0.0  ;;  %s310_s19 = sld [smem:[#allocation2]] (!%p513_p5) }
  0x43   : > { %594 = vpow2.f32 %v266_v28  ;;  %v231_v2 = vmul.f32 %v215_v55, %v888_v5  ;;  %v235_v12 = vsub.f32 %v219_v42, %v227_v52  ;;  %v232_v14 = vmul.f32 %v216_v60, %v890_v6 }
  0x44   : > { %596 = vpow2.f32 %v268_v29  ;;  %v236_v15 = vsub.f32 %v220_v46, %v228_v57  ;;  %v225_v17 = vmax.f32 %v892_v7, 0.0  ;;  %v233_v4 = vmul.f32 %v217_v0, %v892_v7 }
  0x45   : > { %v587_v32 = vpop.eup %586  ;;  %598 = vpow2.f32 %v270_v30  ;;  %v237_v18 = vsub.f32 %v221_v51, %v229_v62  ;;  %v238_v21 = vsub.f32 %v222_v56, %v230_v1  ;;  %v239_v24 = vsub.f32 %v223_v61, %v231_v2 }
  0x46   : > { %v589_v33 = vpop.eup %588  ;;  %600 = vpow2.f32 %v272_v31  ;;  %v274_v35 = vadd.f32 1.0, %v587_v32  ;;  %v240_v27 = vsub.f32 %v224_v11, %v232_v14  ;;  %v241_v31 = vsub.f32 %v225_v17, %v233_v4 }
  0x47   : > { %v591_v36 = vpop.eup %590  ;;  %v275_v38 = vadd.f32 1.0, %v589_v33 }
  0x48   : > { %v593_v39 = vpop.eup %592  ;;  %v276_v43 = vadd.f32 1.0, %v591_v36  ;;  %602 = vlog2.f32 %v274_v35 }
  0x49   : > { %v595_v44 = vpop.eup %594  ;;  %v277_v48 = vadd.f32 1.0, %v593_v39  ;;  %604 = vlog2.f32 %v275_v38 }
  0x4a   : > { %v597_v49 = vpop.eup %596  ;;  %v278_v53 = vadd.f32 1.0, %v595_v44  ;;  %606 = vlog2.f32 %v276_v43 }
  0x4b   : > { %v599_v54 = vpop.eup %598  ;;  %v279_v58 = vadd.f32 1.0, %v597_v49  ;;  %608 = vlog2.f32 %v277_v48 }
  0x4c   : > { %v601_v59 = vpop.eup %600  ;;  %v280_v63 = vadd.f32 1.0, %v599_v54  ;;  %610 = vlog2.f32 %v278_v53 }
  0x4d   : > { %v281_v9 = vadd.f32 1.0, %v601_v59  ;;  %612 = vlog2.f32 %v279_v58 }
  0x4e   : > { %v603_v10 = vpop.eup %602  ;;  %614 = vlog2.f32 %v280_v63 }
  0x4f   : > { %v605_v13 = vpop.eup %604  ;;  %v283_v3 = vmul.f32 0.6931472, %v603_v10  ;;  %616 = vlog2.f32 %v281_v9 }
  0x50   : > { %v607_v16 = vpop.eup %606  ;;  %v285_v19 = vmul.f32 0.6931472, %v605_v13 }
  0x51   : > { %v609_v20 = vpop.eup %608  ;;  %v287_v22 = vmul.f32 0.6931472, %v607_v16  ;;  %v926_v23 = vadd.f32 %v283_v3, %v234_v8 }
  0x52   : > { %v611_v5 = vpop.eup %610  ;;  %v289_v25 = vmul.f32 0.6931472, %v609_v20  ;;  %v928_v26 = vadd.f32 %v285_v19, %v235_v12 }
  0x53   : > { %v613_v6 = vpop.eup %612  ;;  %v291_v28 = vmul.f32 0.6931472, %v611_v5  ;;  %v930_v29 = vadd.f32 %v287_v22, %v236_v15 }
  0x54   : > { %v615_v30 = vpop.eup %614  ;;  %v293_v7 = vmul.f32 0.6931472, %v613_v6  ;;  %v932_v32 = vadd.f32 %v289_v25, %v237_v18  ;;  %309 = sbr.rel (%p513_p5) target bundleno = 284 (0x11c), region = 44 }
  0x55   : > { %v617_v33 = vpop.eup %616  ;;  %v295_v34 = vmul.f32 0.6931472, %v615_v30  ;;  %v934_v35 = vadd.f32 %v291_v28, %v238_v21 }
  0x56   : > { %v297_v36 = vmul.f32 0.6931472, %v617_v33  ;;  %v936_v37 = vadd.f32 %v293_v7, %v239_v24 }
  0x57   : > { %v938_v38 = vadd.f32 %v295_v34, %v240_v27 }
  0x58   : > { %v940_v39 = vadd.f32 %v297_v36, %v241_v31 }
  0x59   : > { %v311_v40 = vadd.f32 %v928_v26, %v926_v23 }
  0x5b   : > { %v312_v41 = vadd.f32 %v311_v40, %v930_v29 }
  0x5d   : > { %v313_v42 = vadd.f32 %v312_v41, %v932_v32 }
  0x5f   : > { %v314_v43 = vadd.f32 %v313_v42, %v934_v35 }
  0x61   : > { %v315_v44 = vadd.f32 %v314_v43, %v936_v37 }
  0x63   : > { %v316_v45 = vadd.f32 %v315_v44, %v938_v38 }
  0x65   : > { %v317_v46 = vadd.f32 %v316_v45, %v940_v39 }
  0x67   : > { %318 = vadd.xlane.f32.xlu0 %v317_v46 }
  0xda   : > { %v319_v47 = vpop.xlane.xlu0 %318 }
  0xdb   : > { %v320_v48 = vrot.slane %v319_v47, 4 }
  0xdd   : > { %v321_v49 = vadd.f32 %v320_v48, %v319_v47 }
  0xdf   : > { %v322_v50 = vrot.slane %v321_v49, 2 }
  0xe1   : > { %v323_v51 = vadd.f32 %v322_v50, %v321_v49 }
  0xe3   : > { %v324_v52 = vrot.slane %v323_v51, 1 }
  0xe5   : > { %v325_v53 = vadd.f32 %v324_v52, %v323_v51 }
  0xe7   : > { %522 = vpush %v325_v53 }
 0x118   : > { %s523_s15 = spop %522 }
 0x119   : > { %s327_s16 = sadd.f32 %s523_s15, %s310_s19 }
 0x11b   : > { %329 = sst [smem:[#allocation2]] %s327_s16 }
 0x11c PF: > { %p514_p7 = scmp.ne.s32.totalorder %s777_s13, 3 }
 0x11d   : > { %s515_s24 = sshll.u32 (!%p514_p7), %s777_s13, 13  ;;  %s371_s25 = sld [smem:[#allocation2]] (!%p514_p7) }
 0x11e   : > { %333 = sbr.rel (%p514_p7) target bundleno = 502 (0x1f6), region = 48 }
 0x123   : > { %v335_v54 = vlaneseq  ;;  %v352_v56 = vstv %s515_s24 }
 0x125   : > { %v336_v55 = vshrl.u32 %v335_v54, 7  ;;  %v362_v57 = vand.u32 127, %v335_v54 }
 0x127   : > { %v337_v58 = vadd.s32 8, %v336_v55  ;;  %v338_v59 = vadd.s32 16, %v336_v55  ;;  %v339_v60 = vadd.s32 24, %v336_v55  ;;  %v340_v61 = vadd.s32 32, %v336_v55 }
 0x128   : > { %v341_v62 = vadd.s32 40, %v336_v55  ;;  %v342_v63 = vadd.s32 48, %v336_v55  ;;  %v343_v0 = vadd.s32 56, %v336_v55  ;;  %v344_v1 = vmul.u32 128, %v336_v55 }
 0x129   : > { %v345_v8 = vmul.u32 128, %v337_v58  ;;  %v346_v9 = vmul.u32 128, %v338_v59  ;;  %v347_v10 = vmul.u32 128, %v339_v60  ;;  %v348_v11 = vmul.u32 128, %v340_v61 }
 0x12a   : > { %v349_v2 = vmul.u32 128, %v341_v62  ;;  %v350_v12 = vmul.u32 128, %v342_v63  ;;  %v353_v13 = vadd.s32 %v352_v56, %v344_v1  ;;  %v351_v17 = vmul.u32 128, %v343_v0 }
 0x12b   : > { %v354_v14 = vadd.s32 %v352_v56, %v345_v8  ;;  %v355_v15 = vadd.s32 %v352_v56, %v346_v9  ;;  %v356_v3 = vadd.s32 %v352_v56, %v347_v10  ;;  %v357_v16 = vadd.s32 %v352_v56, %v348_v11 }
 0x12c   : > { %v358_v4 = vadd.s32 %v352_v56, %v349_v2  ;;  %v363_v18 = vadd.s32 %v362_v57, %v353_v13  ;;  %v359_v22 = vadd.s32 %v352_v56, %v350_v12  ;;  %v360_v24 = vadd.s32 %v352_v56, %v351_v17 }
 0x12d   : > { %v364_v19 = vadd.s32 %v362_v57, %v354_v14  ;;  %v365_v20 = vadd.s32 %v362_v57, %v355_v15  ;;  %v366_v21 = vadd.s32 %v362_v57, %v356_v3  ;;  %v367_v5 = vadd.s32 %v362_v57, %v357_v16 }
 0x12e   : > { %vm372_vm0 = vcmp.lt.s32.totalorder %v363_v18, 27648  ;;  %v368_v25 = vadd.s32 %v362_v57, %v358_v4  ;;  %v369_v30 = vadd.s32 %v362_v57, %v359_v22  ;;  %v370_v33 = vadd.s32 %v362_v57, %v360_v24 }
 0x12f   : > { %vm373_vm1 = vcmp.lt.s32.totalorder %v364_v19, 27648  ;;  %vm374_vm2 = vcmp.lt.s32.totalorder %v365_v20, 27648  ;;  %vm375_vm3 = vcmp.lt.s32.totalorder %v366_v21, 27648  ;;  %v380_v6 = vsel %vm372_vm0, %v926_v23, 0.0 }
 0x130   : > { %v381_v27 = vsel %vm373_vm1, %v928_v26, 0.0  ;;  %v382_v28 = vsel %vm374_vm2, %v930_v29, 0.0  ;;  %vm376_vm4 = vcmp.lt.s32.totalorder %v367_v5, 27648  ;;  %v383_v7 = vsel %vm375_vm3, %v932_v32, 0.0 }
 0x131   : > { %v388_v31 = vadd.f32 %v381_v27, %v380_v6  ;;  %vm377_vm5 = vcmp.lt.s32.totalorder %v368_v25, 27648  ;;  %v384_v36 = vsel %vm376_vm4, %v934_v35, 0.0  ;;  %vm378_vm6 = vcmp.lt.s32.totalorder %v369_v30, 27648 }
 0x132   : > { %v385_v41 = vsel %vm377_vm5, %v936_v37, 0.0  ;;  %vm379_vm7 = vcmp.lt.s32.totalorder %v370_v33, 27648  ;;  %v386_v26 = vsel %vm378_vm6, %v938_v38, 0.0  ;;  %v741_v32 = vmov 27648.0  }
 0x133   : > { %v389_v34 = vadd.f32 %v388_v31, %v382_v28  ;;  %v387_v29 = vsel %vm379_vm7, %v940_v39, 0.0  ;;  %618 = vrcp.f32 %v741_v32 }
 0x135   : > { %v390_v40 = vadd.f32 %v389_v34, %v383_v7 }
 0x137   : > { %v391_v23 = vadd.f32 %v390_v40, %v384_v36 }
 0x139   : > { %v392_v42 = vadd.f32 %v391_v23, %v385_v41  ;;  %v619_v45 = vpop.eup %618 }
 0x13a   : > { %v409_v46 = vmul.f32 27648.0, %v619_v45  ;;  %vm413_vm8 = vweird.f32 %v619_v45 }
 0x13b   : > { %v393_v43 = vadd.f32 %v392_v42, %v386_v26 }
 0x13c   : > { %v410_v47 = vsub.f32 1.0, %v409_v46 }
 0x13d   : > { %v394_v44 = vadd.f32 %v393_v43, %v387_v29 }
 0x13e   : > { %v411_v50 = vmul.f32 %v619_v45, %v410_v47 }
 0x13f   : > { %395 = vadd.xlane.f32.xlu0 %v394_v44 }
 0x140   : > { %v412_v52 = vadd.f32 %v619_v45, %v411_v50 }
 0x142   : > { %v414_v54 = vsel %vm413_vm8, %v619_v45, %v412_v52 }
 0x1b2   : > { %v396_v35 = vpop.xlane.xlu0 %395 }
 0x1b3   : > { %v397_v48 = vrot.slane %v396_v35, 4 }
 0x1b5   : > { %v398_v49 = vadd.f32 %v397_v48, %v396_v35 }
 0x1b7   : > { %v399_v37 = vrot.slane %v398_v49, 2 }
 0x1b9   : > { %v400_v51 = vadd.f32 %v399_v37, %v398_v49 }
 0x1bb   : > { %v401_v38 = vrot.slane %v400_v51, 1 }
 0x1bd   : > { %v402_v53 = vadd.f32 %v401_v38, %v400_v51 }
 0x1bf   : > { %524 = vpush %v402_v53 }
 0x1c0   : > { %526 = vpush %v414_v54 }
 0x1f0   : > { %s525_s26 = spop %524 }
 0x1f1   : > { %s404_s3 = sadd.f32 %s525_s26, %s371_s25  ;;  %s527_s4 = spop %526 }
 0x1f3   : > { %406 = sst [smem:[#allocation2]] %s404_s3  ;;  %s416_s5 = smul.f32 %s527_s4, %s404_s3 }
 0x1f5   : > { %418 = sst [smem:[#allocation8]] %s416_s5 }
 0x1f6 PF: > { %p547_p8 = scmp.eq.s32.totalorder %s777_s13, 3  ;;  %s425_s12 = sshll.u32 %s980_s2, 4  ;;  %s426_s12 = int_to_ptr.hbm [resolvable:$true] %s425_s12 }
 0x1f7   : > { %s742_s22 = smov [#allocation8]  }
 0x1f8   : > { %535 = dma.smem_to_hbm (%p547_p8), %s742_s22, 16, %s426_s12, [#allocation5]  }
 0x1f9   : > { %719 = dma.done.wait (%p547_p8), [#allocation5], 16  }
 0x1fa   : > { %721 = vsyncadd (%p547_p8), [#allocation5], 4294967280 }
 0x1fb   : > { %434 = sfence }
 0x1fc PF: > { %p16_p11 = scmp.ge.s32.totalorder %s780_s14, 6   ;;  %s985_s9 = smov %s728_s10 }
 0x1fd   : > { %s986_s10 = smov %s732_s11  ;;  %s987_s11 = smov %s790_s17 }
 0x1fe   : > { %s988_s12 = smov %s780_s14  ;;  %18 = sbr.rel (!%p16_p11) target bundleno = 6 (0x6), region = 94 }
 0x203   :  { %440 = vsyncpa [#allocation4], 1 }
 0x204   :  { %442 = vsyncpa [#allocation4 + $0x1], 1 }
 0x205   :  { %443 = vsyncpa [#allocation7], 1 }
 0x206   :  { %445 = vsyncpa [#allocation7 + $0x1], 1 }
 0x207   :  { %446 = vsyncpa [#allocation5], 1 }
 0x208   :  { %448 = vsyncpa [#allocation5 + $0x1], 1 }

</bundles_post_ra>
